<compile_context>
chip_gen: v5e
topology: v5e:2x2
jax: 0.10.0
libtpu: 0.0.40
codegen_flags: <defaults>
</compile_context>

<pallas_src>
import functools

import jax
import jax.numpy as jnp
from jax.experimental import pallas as pl
from jax.experimental.pallas import tpu as pltpu

D_IN, D_H1, D_H2, D_OUT = 512, 256, 128, 24
D_OUT_PAD = 128  # lane-dense padded output width


def _round_up(x, m):
    return ((x + m - 1) // m) * m


def _mlp_kernel(x_ref, w1_ref, b1_ref, w2_ref, b2_ref, w3_ref, b3_ref, o_ref):
    """Fused 3-layer MLP on one batch tile. bf16 MXU inputs, f32 accum/bias/ReLU."""
    x = x_ref[...]                                                      # (TM, 512) bf16
    h1 = jnp.dot(x, w1_ref[...], preferred_element_type=jnp.float32)   # (TM, 256) f32
    h1 = jnp.maximum(h1 + b1_ref[...], 0.0)                            # bias + ReLU in f32
    h2 = jnp.dot(h1.astype(jnp.bfloat16), w2_ref[...],
                 preferred_element_type=jnp.float32)                   # (TM, 128) f32
    h2 = jnp.maximum(h2 + b2_ref[...], 0.0)
    # TODO(synk): dropout is identity in eval mode; training-mode masking not implemented.
    out = jnp.dot(h2.astype(jnp.bfloat16), w3_ref[...],
                  preferred_element_type=jnp.float32)                  # (TM, 128) f32
    o_ref[...] = (out + b3_ref[...]).astype(o_ref.dtype)


@functools.partial(jax.jit, static_argnames=("tile_m",))
def visual_network_forward(x, params, tile_m=256):
    """x: (B, 512) float32. Returns (B, 24) float32."""
    w1, b1, w2, b2, w3, b3 = params
    B = x.shape[0]

    # Pick an MXU-friendly batch tile; pad the batch to a multiple of it.
    tm = min(tile_m, _round_up(B, 8))
    b_pad = _round_up(B, tm)
    if b_pad != B:
        x = jnp.pad(x, ((0, b_pad - B), (0, 0)))

    # bf16 MXU operands (halves x/weight DMA, doubles MXU throughput on v6e/v7x).
    x_bf = x.astype(jnp.bfloat16)
    w1_bf = w1.astype(jnp.bfloat16)
    w2_bf = w2.astype(jnp.bfloat16)
    # Zero-pad the last layer to 128 output lanes for an unmasked, lane-dense store.
    w3_bf = jnp.pad(w3, ((0, 0), (0, D_OUT_PAD - D_OUT))).astype(jnp.bfloat16)
    b3_p = jnp.pad(b3, ((0, 0), (0, D_OUT_PAD - D_OUT)))

    grid = (b_pad // tm,)

    in_specs = [
        pl.BlockSpec((tm, D_IN), lambda i: (i, 0)),          # x (batch-tiled)
        pl.BlockSpec((D_IN, D_H1), lambda i: (0, 0)),        # w1 (grid-invariant)
        pl.BlockSpec((1, D_H1), lambda i: (0, 0)),           # b1
        pl.BlockSpec((D_H1, D_H2), lambda i: (0, 0)),        # w2
        pl.BlockSpec((1, D_H2), lambda i: (0, 0)),           # b2
        pl.BlockSpec((D_H2, D_OUT_PAD), lambda i: (0, 0)),   # w3 (padded)
        pl.BlockSpec((1, D_OUT_PAD), lambda i: (0, 0)),      # b3 (padded)
    ]
    out_specs = pl.BlockSpec((tm, D_OUT_PAD), lambda i: (i, 0))

    flops = 2 * b_pad * (D_IN * D_H1 + D_H1 * D_H2 + D_H2 * D_OUT_PAD)
    bytes_accessed = (
        b_pad * D_IN * 2                                      # x (bf16)
        + (D_IN * D_H1 + D_H1 * D_H2 + D_H2 * D_OUT_PAD) * 2  # weights (bf16)
        + (D_H1 + D_H2 + D_OUT_PAD) * 4                       # biases (f32)
        + b_pad * D_OUT_PAD * 4                               # output (f32)
    )

    out = pl.pallas_call(
        _mlp_kernel,
        out_shape=jax.ShapeDtypeStruct((b_pad, D_OUT_PAD), jnp.float32),
        grid_spec=pltpu.PrefetchScalarGridSpec(
            num_scalar_prefetch=0,
            grid=grid,
            in_specs=in_specs,
            out_specs=out_specs,
        ),
        compiler_params=pltpu.CompilerParams(
            dimension_semantics=("parallel",),
        ),
        cost_estimate=pl.CostEstimate(
            flops=flops, transcendentals=0, bytes_accessed=bytes_accessed
        ),
    )(x_bf, w1_bf, b1, w2_bf, b2, w3_bf, b3_p)

    return out[:B, :D_OUT]


def init_params(key):
    """Deterministic init matching nn.Linear default: U(-1/sqrt(fan_in), 1/sqrt(fan_in))."""
    def linear(k, fan_in, fan_out):
        kw, kb = jax.random.split(k)
        bound = 1.0 / jnp.sqrt(fan_in)
        w = jax.random.uniform(kw, (fan_in, fan_out), jnp.float32, -bound, bound)
        b = jax.random.uniform(kb, (1, fan_out), jnp.float32, -bound, bound)
        return w, b

    k1, k2, k3 = jax.random.split(key, 3)
    w1, b1 = linear(k1, D_IN, D_H1)
    w2, b2 = linear(k2, D_H1, D_H2)
    w3, b3 = linear(k3, D_H2, D_OUT)
    return (w1, b1, w2, b2, w3, b3)


def reference_forward(x, params):
    w1, b1, w2, b2, w3, b3 = params
    h1 = jnp.maximum(x @ w1 + b1, 0.0)
    h2 = jnp.maximum(h1 @ w2 + b2, 0.0)
    return h2 @ w3 + b3


if __name__ == "__main__":
    key = jax.random.PRNGKey(0)
    k_params, k_x = jax.random.split(key)

    params = init_params(k_params)

    # Small test shapes; batch=8 (tile-aligned) and batch=5 (exercises padding path).
    for batch in (8, 5):
        x = jax.random.normal(jax.random.fold_in(k_x, batch), (batch, D_IN), jnp.float32)

        out = visual_network_forward(x, params)
        out = jax.block_until_ready(out)

        ref = reference_forward(x, params)
        assert out.shape == (batch, D_OUT), out.shape
        # bf16 MXU inputs -> compare against f32 reference with a loosened tolerance.
        assert jnp.allclose(out, ref, atol=5e-2, rtol=5e-2), "mismatch vs reference"

    print("KERNEL_OK")
</pallas_src>

<mosaic_0001>
module attributes {stable_mosaic.version = 11 : i64} {
  func.func @_mlp_kernel(%arg0: i32, %arg1: memref<8x512xbf16, #tpu.memory_space<vmem>>, %arg2: memref<512x256xbf16, #tpu.memory_space<vmem>>, %arg3: memref<1x256xf32, #tpu.memory_space<vmem>>, %arg4: memref<256x128xbf16, #tpu.memory_space<vmem>>, %arg5: memref<1x128xf32, #tpu.memory_space<vmem>>, %arg6: memref<128x128xbf16, #tpu.memory_space<vmem>>, %arg7: memref<1x128xf32, #tpu.memory_space<vmem>>, %arg8: memref<8x128xf32, #tpu.memory_space<vmem>>) attributes {dimension_semantics = [#tpu.dimension_semantics<parallel>], iteration_bounds = array<i64: 1>, scalar_prefetch = 0 : i64, scratch_operands = 0 : i64, tpu.core_type = #tpu.core_type<tc>, window_params = [{transform_indices = @transform_0, window_bounds = array<i64: 8, 512>}, {pipeline_mode = #tpu.pipeline_mode<synchronous>, transform_indices = @transform_1, window_bounds = array<i64: 512, 256>}, {pipeline_mode = #tpu.pipeline_mode<synchronous>, transform_indices = @transform_2, window_bounds = array<i64: 1, 256>}, {pipeline_mode = #tpu.pipeline_mode<synchronous>, transform_indices = @transform_3, window_bounds = array<i64: 256, 128>}, {pipeline_mode = #tpu.pipeline_mode<synchronous>, transform_indices = @transform_4, window_bounds = array<i64: 1, 128>}, {pipeline_mode = #tpu.pipeline_mode<synchronous>, transform_indices = @transform_5, window_bounds = array<i64: 128, 128>}, {pipeline_mode = #tpu.pipeline_mode<synchronous>, transform_indices = @transform_6, window_bounds = array<i64: 1, 128>}, {transform_indices = @transform_7, window_bounds = array<i64: 8, 128>}]} {
    %c0 = arith.constant 0 : index
    %c0_0 = arith.constant 0 : index
    %0 = vector.load %arg1[%c0, %c0_0] : memref<8x512xbf16, #tpu.memory_space<vmem>>, vector<8x512xbf16>
    %c0_1 = arith.constant 0 : index
    %c0_2 = arith.constant 0 : index
    %1 = vector.load %arg2[%c0_1, %c0_2] : memref<512x256xbf16, #tpu.memory_space<vmem>>, vector<512x256xbf16>
    %cst = arith.constant dense<0.000000e+00> : vector<8x256xf32>
    %2 = tpu.matmul %0, %1, %cst {dimension_numbers = #tpu.dot_dimension_numbers<[1], [0], [0], [1], [0, 0, 1, 1], [], []>} : vector<8x512xbf16>, vector<512x256xbf16>, vector<8x256xf32> -> vector<8x256xf32>
    %c0_3 = arith.constant 0 : index
    %c0_4 = arith.constant 0 : index
    %3 = vector.load %arg3[%c0_3, %c0_4] : memref<1x256xf32, #tpu.memory_space<vmem>>, vector<1x256xf32>
    %4 = vector.broadcast %3 : vector<1x256xf32> to vector<8x256xf32>
    %5 = arith.addf %2, %4 : vector<8x256xf32>
    %cst_5 = arith.constant 0.000000e+00 : f32
    %6 = vector.broadcast %cst_5 : f32 to vector<8x256xf32>
    %7 = arith.maximumf %5, %6 : vector<8x256xf32>
    %8 = arith.truncf %7 : vector<8x256xf32> to vector<8x256xbf16>
    %c0_6 = arith.constant 0 : index
    %c0_7 = arith.constant 0 : index
    %9 = vector.load %arg4[%c0_6, %c0_7] : memref<256x128xbf16, #tpu.memory_space<vmem>>, vector<256x128xbf16>
    %cst_8 = arith.constant dense<0.000000e+00> : vector<8x128xf32>
    %10 = tpu.matmul %8, %9, %cst_8 {dimension_numbers = #tpu.dot_dimension_numbers<[1], [0], [0], [1], [0, 0, 1, 1], [], []>} : vector<8x256xbf16>, vector<256x128xbf16>, vector<8x128xf32> -> vector<8x128xf32>
    %c0_9 = arith.constant 0 : index
    %c0_10 = arith.constant 0 : index
    %11 = vector.load %arg5[%c0_9, %c0_10] : memref<1x128xf32, #tpu.memory_space<vmem>>, vector<1x128xf32>
    %12 = vector.broadcast %11 : vector<1x128xf32> to vector<8x128xf32>
    %13 = arith.addf %10, %12 : vector<8x128xf32>
    %cst_11 = arith.constant 0.000000e+00 : f32
    %14 = vector.broadcast %cst_11 : f32 to vector<8x128xf32>
    %15 = arith.maximumf %13, %14 : vector<8x128xf32>
    %16 = arith.truncf %15 : vector<8x128xf32> to vector<8x128xbf16>
    %c0_12 = arith.constant 0 : index
    %c0_13 = arith.constant 0 : index
    %17 = vector.load %arg6[%c0_12, %c0_13] : memref<128x128xbf16, #tpu.memory_space<vmem>>, vector<128x128xbf16>
    %cst_14 = arith.constant dense<0.000000e+00> : vector<8x128xf32>
    %18 = tpu.matmul %16, %17, %cst_14 {dimension_numbers = #tpu.dot_dimension_numbers<[1], [0], [0], [1], [0, 0, 1, 1], [], []>} : vector<8x128xbf16>, vector<128x128xbf16>, vector<8x128xf32> -> vector<8x128xf32>
    %c0_15 = arith.constant 0 : index
    %c0_16 = arith.constant 0 : index
    %19 = vector.load %arg7[%c0_15, %c0_16] : memref<1x128xf32, #tpu.memory_space<vmem>>, vector<1x128xf32>
    %20 = vector.broadcast %19 : vector<1x128xf32> to vector<8x128xf32>
    %21 = arith.addf %18, %20 : vector<8x128xf32>
    %c0_17 = arith.constant 0 : index
    %c0_18 = arith.constant 0 : index
    %22 = vector.load %arg8[%c0_17, %c0_18] : memref<8x128xf32, #tpu.memory_space<vmem>>, vector<8x128xf32>
    tpu.vector_store %arg8[%c0_17, %c0_18], %21 {strides = array<i32>} : memref<8x128xf32, #tpu.memory_space<vmem>>, vector<8x128xf32>,
    return
  }
  func.func @transform_0(%arg0: i32) -> (i32, i32) {
    %c0_i32 = arith.constant 0 : i32
    %c0_i32_0 = arith.constant 0 : i32
    return %arg0, %c0_i32 : i32, i32
  }
  func.func @transform_1(%arg0: i32) -> (i32, i32) {
    %c0_i32 = arith.constant 0 : i32
    %c0_i32_0 = arith.constant 0 : i32
    %c0_i32_1 = arith.constant 0 : i32
    return %c0_i32, %c0_i32_0 : i32, i32
  }
  func.func @transform_2(%arg0: i32) -> (i32, i32) {
    %c0_i32 = arith.constant 0 : i32
    %c0_i32_0 = arith.constant 0 : i32
    %c0_i32_1 = arith.constant 0 : i32
    return %c0_i32, %c0_i32_0 : i32, i32
  }
  func.func @transform_3(%arg0: i32) -> (i32, i32) {
    %c0_i32 = arith.constant 0 : i32
    %c0_i32_0 = arith.constant 0 : i32
    %c0_i32_1 = arith.constant 0 : i32
    return %c0_i32, %c0_i32_0 : i32, i32
  }
  func.func @transform_4(%arg0: i32) -> (i32, i32) {
    %c0_i32 = arith.constant 0 : i32
    %c0_i32_0 = arith.constant 0 : i32
    %c0_i32_1 = arith.constant 0 : i32
    return %c0_i32, %c0_i32_0 : i32, i32
  }
  func.func @transform_5(%arg0: i32) -> (i32, i32) {
    %c0_i32 = arith.constant 0 : i32
    %c0_i32_0 = arith.constant 0 : i32
    %c0_i32_1 = arith.constant 0 : i32
    return %c0_i32, %c0_i32_0 : i32, i32
  }
  func.func @transform_6(%arg0: i32) -> (i32, i32) {
    %c0_i32 = arith.constant 0 : i32
    %c0_i32_0 = arith.constant 0 : i32
    %c0_i32_1 = arith.constant 0 : i32
    return %c0_i32, %c0_i32_0 : i32, i32
  }
  func.func @transform_7(%arg0: i32) -> (i32, i32) {
    %c0_i32 = arith.constant 0 : i32
    %c0_i32_0 = arith.constant 0 : i32
    return %arg0, %c0_i32 : i32, i32
  }
}

</mosaic_0001>

<bundles_post_ra>
// kernel: visual_network_forward.1
= control target key start
LH: loop header
LB: loop body
LE: loop exit
PB: predicated region body
PF: predicated region fallthrough
CT: control target
= control target key end

     0   :  { %s1799_s0 = inlined_call_operand.vmem [shape: bf16[8,512], index: 0, kind: input, shape index: {}]   ;;  %s1800_s1 = inlined_call_operand.vmem [shape: bf16[512,256], index: 1, kind: input, shape index: {}]   ;;  %s1801_s2 = inlined_call_operand.vmem [shape: f32[1,256], index: 2, kind: input, shape index: {}]   ;;  %s1802_s3 = inlined_call_operand.vmem [shape: bf16[256,128], index: 3, kind: input, shape index: {}]   ;;  %s1803_s4 = inlined_call_operand.vmem [shape: f32[1,128], index: 4, kind: input, shape index: {}]   ;;  %s1804_s5 = inlined_call_operand.vmem [shape: bf16[128,128], index: 5, kind: input, shape index: {}]   ;;  %s1805_s6 = inlined_call_operand.vmem [shape: f32[1,128], index: 6, kind: input, shape index: {}]   ;;  %s1806_s7 = inlined_call_operand.hbm [shape: f32[8,128], index: 7, kind: output, shape index: {}]  }
   0x1   :  { %v857_v0 = vld [vmem:[%s1800_s1 + $0x70] sm:$0xf]  ;;  %v1166_v1 = vld [vmem:[%s1800_s1 + $0x74] sm:$0xf0]  ;;  %v849_v11 = vld [vmem:[%s1800_s1 + $0x60] sm:$0xf] }
   0x2   :  { %v921_v2 = vld [vmem:[%s1800_s1 + $0xf0] sm:$0xf]  ;;  %v858_v3 = vor.u32 %v1166_v1, %v857_v0  ;;  %v1182_v4 = vld [vmem:[%s1800_s1 + $0xf4] sm:$0xf0]  ;;  %v1164_v13 = vld [vmem:[%s1800_s1 + $0x64] sm:$0xf0] }
   0x3   :  { %v985_v5 = vld [vmem:[%s1800_s1 + $0x170] sm:$0xf]  ;;  %v1198_v6 = vld [vmem:[%s1800_s1 + $0x174] sm:$0xf0]  ;;  %v922_v7 = vor.u32 %v1182_v4, %v921_v2  ;;  %v913_v14 = vld [vmem:[%s1800_s1 + $0xe0] sm:$0xf]  ;;  %v850_v16 = vor.u32 %v1164_v13, %v849_v11 }
   0x4   :  { %v986_v8 = vor.u32 %v1198_v6, %v985_v5  ;;  %v1049_v9 = vld [vmem:[%s1800_s1 + $0x1f0] sm:$0xf]  ;;  %v1214_v10 = vld [vmem:[%s1800_s1 + $0x1f4] sm:$0xf0]  ;;  %433 = vmatpush.bf16.msra.mxu0 %v858_v3  ;;  %v1180_v15 = vld [vmem:[%s1800_s1 + $0xe4] sm:$0xf0] }
   0x5   :  { %v1050_v12 = vor.u32 %v1214_v10, %v1049_v9  ;;  %446 = vmatpush.bf16.msra.mxu1 %v922_v7  ;;  %v914_v17 = vor.u32 %v1180_v15, %v913_v14  ;;  %v977_v18 = vld [vmem:[%s1800_s1 + $0x160] sm:$0xf]  ;;  %v1196_v19 = vld [vmem:[%s1800_s1 + $0x164] sm:$0xf0]  ;;  %v841_v23 = vld [vmem:[%s1800_s1 + $0x50] sm:$0xf] }
   0x6   :  { %459 = vmatpush.bf16.msra.mxu2 %v986_v8  ;;  %v1041_v20 = vld [vmem:[%s1800_s1 + $0x1e0] sm:$0xf]  ;;  %v978_v21 = vor.u32 %v1196_v19, %v977_v18  ;;  %v1212_v22 = vld [vmem:[%s1800_s1 + $0x1e4] sm:$0xf0]  ;;  %v1162_v24 = vld [vmem:[%s1800_s1 + $0x54] sm:$0xf0] }
   0x7   :  { %472 = vmatpush.bf16.msra.mxu3 %v1050_v12  ;;  %v1042_v25 = vor.u32 %v1212_v22, %v1041_v20  ;;  %v905_v26 = vld [vmem:[%s1800_s1 + $0xd0] sm:$0xf]  ;;  %v1178_v27 = vld [vmem:[%s1800_s1 + $0xd4] sm:$0xf0]  ;;  %v842_v29 = vor.u32 %v1162_v24, %v841_v23  ;;  %v833_v35 = vld [vmem:[%s1800_s1 + $0x40] sm:$0xf] }
   0x8   :  { %v969_v28 = vld [vmem:[%s1800_s1 + $0x150] sm:$0xf]  ;;  %434 = vmatpush.bf16.msra.mxu0 %v850_v16  ;;  %v1194_v30 = vld [vmem:[%s1800_s1 + $0x154] sm:$0xf0]  ;;  %v906_v33 = vor.u32 %v1178_v27, %v905_v26  ;;  %v1160_v36 = vld [vmem:[%s1800_s1 + $0x44] sm:$0xf0] }
   0x9   :  { %v1033_v31 = vld [vmem:[%s1800_s1 + $0x1d0] sm:$0xf]  ;;  %v1210_v32 = vld [vmem:[%s1800_s1 + $0x1d4] sm:$0xf0]  ;;  %447 = vmatpush.bf16.msra.mxu1 %v914_v17  ;;  %v970_v34 = vor.u32 %v1194_v30, %v969_v28  ;;  %v897_v37 = vld [vmem:[%s1800_s1 + $0xc0] sm:$0xf]  ;;  %v834_v44 = vor.u32 %v1160_v36, %v833_v35 }
   0xa   :  { %460 = vmatpush.bf16.msra.mxu2 %v978_v21  ;;  %v1034_v38 = vor.u32 %v1210_v32, %v1033_v31  ;;  %v1176_v39 = vld [vmem:[%s1800_s1 + $0xc4] sm:$0xf0]  ;;  %v961_v40 = vld [vmem:[%s1800_s1 + $0x140] sm:$0xf]  ;;  %v825_v47 = vld [vmem:[%s1800_s1 + $0x30] sm:$0xf] }
   0xb   :  { %473 = vmatpush.bf16.msra.mxu3 %v1042_v25  ;;  %v1192_v41 = vld [vmem:[%s1800_s1 + $0x144] sm:$0xf0]  ;;  %v1025_v42 = vld [vmem:[%s1800_s1 + $0x1c0] sm:$0xf]  ;;  %v898_v45 = vor.u32 %v1176_v39, %v897_v37  ;;  %v1158_v48 = vld [vmem:[%s1800_s1 + $0x34] sm:$0xf0] }
   0xc   :  { %v1208_v43 = vld [vmem:[%s1800_s1 + $0x1c4] sm:$0xf0]  ;;  %435 = vmatpush.bf16.msra.mxu0 %v842_v29  ;;  %v962_v46 = vor.u32 %v1192_v41, %v961_v40  ;;  %v889_v49 = vld [vmem:[%s1800_s1 + $0xb0] sm:$0xf]  ;;  %v1174_v51 = vld [vmem:[%s1800_s1 + $0xb4] sm:$0xf0]  ;;  %v826_v56 = vor.u32 %v1158_v48, %v825_v47 }
   0xd   :  { %448 = vmatpush.bf16.msra.mxu1 %v906_v33  ;;  %v1026_v50 = vor.u32 %v1208_v43, %v1025_v42  ;;  %v953_v52 = vld [vmem:[%s1800_s1 + $0x130] sm:$0xf]  ;;  %v1190_v53 = vld [vmem:[%s1800_s1 + $0x134] sm:$0xf0]  ;;  %v890_v57 = vor.u32 %v1174_v51, %v889_v49  ;;  %v817_v59 = vld [vmem:[%s1800_s1 + $0x20] sm:$0xf] }
   0xe   :  { %461 = vmatpush.bf16.msra.mxu2 %v970_v34  ;;  %v1017_v54 = vld [vmem:[%s1800_s1 + $0x1b0] sm:$0xf]  ;;  %v1206_v55 = vld [vmem:[%s1800_s1 + $0x1b4] sm:$0xf0]  ;;  %v954_v58 = vor.u32 %v1190_v53, %v953_v52  ;;  %v1156_v60 = vld [vmem:[%s1800_s1 + $0x24] sm:$0xf0] }
   0xf   :  { %474 = vmatpush.bf16.msra.mxu3 %v1034_v38  ;;  %v881_v61 = vld [vmem:[%s1800_s1 + $0xa0] sm:$0xf]  ;;  %v1018_v62 = vor.u32 %v1206_v55, %v1017_v54  ;;  %v1172_v63 = vld [vmem:[%s1800_s1 + $0xa4] sm:$0xf0]  ;;  %v818_v4 = vor.u32 %v1156_v60, %v817_v59  ;;  %v809_v7 = vld [vmem:[%s1800_s1 + $0x10] sm:$0xf] }
  0x10   :  { %436 = vmatpush.bf16.msra.mxu0 %v834_v44  ;;  %v945_v0 = vld [vmem:[%s1800_s1 + $0x120] sm:$0xf]  ;;  %v1188_v1 = vld [vmem:[%s1800_s1 + $0x124] sm:$0xf0]  ;;  %v882_v5 = vor.u32 %v1172_v63, %v881_v61  ;;  %v1154_v8 = vld [vmem:[%s1800_s1 + $0x14] sm:$0xf0] }
  0x11   :  { %449 = vmatpush.bf16.msra.mxu1 %v898_v45  ;;  %v1009_v2 = vld [vmem:[%s1800_s1 + $0x1a0] sm:$0xf]  ;;  %v1204_v3 = vld [vmem:[%s1800_s1 + $0x1a4] sm:$0xf0]  ;;  %v946_v6 = vor.u32 %v1188_v1, %v945_v0  ;;  %v873_v9 = vld [vmem:[%s1800_s1 + $0x90] sm:$0xf]  ;;  %v810_v16 = vor.u32 %v1154_v8, %v809_v7 }
  0x12   :  { %462 = vmatpush.bf16.msra.mxu2 %v962_v46  ;;  %v1010_v10 = vor.u32 %v1204_v3, %v1009_v2  ;;  %v1170_v11 = vld [vmem:[%s1800_s1 + $0x94] sm:$0xf0]  ;;  %v937_v12 = vld [vmem:[%s1800_s1 + $0x110] sm:$0xf]  ;;  %v801_v17 = vld [vmem:[%s1800_s1] sm:$0xf] }
  0x13   :  { %475 = vmatpush.bf16.msra.mxu3 %v1026_v50  ;;  %v1186_v13 = vld [vmem:[%s1800_s1 + $0x114] sm:$0xf0]  ;;  %v1001_v14 = vld [vmem:[%s1800_s1 + $0x190] sm:$0xf]  ;;  %v1152_v18 = vld [vmem:[%s1800_s1 + $0x4] sm:$0xf0]  ;;  %v874_v20 = vor.u32 %v1170_v11, %v873_v9 }
  0x14   :  { %437 = vmatpush.bf16.msra.mxu0 %v826_v56  ;;  %v1202_v15 = vld [vmem:[%s1800_s1 + $0x194] sm:$0xf0]  ;;  %v865_v19 = vld [vmem:[%s1800_s1 + $0x80] sm:$0xf]  ;;  %v938_v21 = vor.u32 %v1186_v13, %v937_v12  ;;  %v1168_v22 = vld [vmem:[%s1800_s1 + $0x84] sm:$0xf0]  ;;  %v802_v32 = vor.u32 %v1152_v18, %v801_v17 }
  0x15   :  { %450 = vmatpush.bf16.msra.mxu1 %v890_v57  ;;  %v929_v23 = vld [vmem:[%s1800_s1 + $0x100] sm:$0xf]  ;;  %v1184_v24 = vld [vmem:[%s1800_s1 + $0x104] sm:$0xf0]  ;;  %v1002_v25 = vor.u32 %v1202_v15, %v1001_v14  ;;  %v1165_v28 = vld [vmem:[%s1800_s1 + $0x74] sm:$0xf]  ;;  %v866_v37 = vor.u32 %v1168_v22, %v865_v19 }
  0x16   :  { %463 = vmatpush.bf16.msra.mxu2 %v954_v58  ;;  %v993_v26 = vld [vmem:[%s1800_s1 + $0x180] sm:$0xf]  ;;  %v1200_v27 = vld [vmem:[%s1800_s1 + $0x184] sm:$0xf0]  ;;  %v859_v29 = vld [vmem:[%s1800_s1 + $0x78] sm:$0xf0]  ;;  %v930_v38 = vor.u32 %v1184_v24, %v929_v23 }
  0x17   :  { %476 = vmatpush.bf16.msra.mxu3 %v1018_v62  ;;  %v1181_v30 = vld [vmem:[%s1800_s1 + $0xf4] sm:$0xf]  ;;  %v28_v31 = vld [vmem:[%s1799_s0 + $0x8] sm:$0xff]  ;;  %v923_v33 = vld [vmem:[%s1800_s1 + $0xf8] sm:$0xf0]  ;;  %v994_v42 = vor.u32 %v1200_v27, %v993_v26  ;;  %v862_v43 = vor.u32 %v1165_v28, %v859_v29 }
  0x18   :  { %438 = vmatpush.bf16.msra.mxu0 %v818_v4  ;;  %v1197_v34 = vld [vmem:[%s1800_s1 + $0x174] sm:$0xf]  ;;  %v987_v35 = vld [vmem:[%s1800_s1 + $0x178] sm:$0xf0]  ;;  %v103_v36 = vunpack.c.l.b16 %v28_v31  ;;  %v104_v41 = vunpack.c.h.b16 %v28_v31  ;;  %v27_v44 = vld [vmem:[%s1799_s0] sm:$0xff]  ;;  %v926_v45 = vor.u32 %v1181_v30, %v923_v33 }
  0x19   :  { %451 = vmatpush.bf16.msra.mxu1 %v882_v5  ;;  %v1213_v39 = vld [vmem:[%s1800_s1 + $0x1f4] sm:$0xf]  ;;  %v1051_v40 = vld [vmem:[%s1800_s1 + $0x1f8] sm:$0xf0]  ;;  %v990_v46 = vor.u32 %v1197_v34, %v987_v35  ;;  %v1163_v47 = vld [vmem:[%s1800_s1 + $0x64] sm:$0xf]  ;;  %v101_v50 = vunpack.c.l.b16 %v27_v44  ;;  %v102_v51 = vunpack.c.h.b16 %v27_v44 }
  0x1a   :  { %464 = vmatpush.bf16.msra.mxu2 %v946_v6  ;;  %v851_v48 = vld [vmem:[%s1800_s1 + $0x68] sm:$0xf0]  ;;  %v1179_v49 = vld [vmem:[%s1800_s1 + $0xe4] sm:$0xf]  ;;  %v1054_v52 = vor.u32 %v1213_v39, %v1051_v40  ;;  %v1549_v56 = vpack.c.b16 %v103_v36, %v103_v36  ;;  %v1559_v60 = vpack.c.b16 %v104_v41, %v104_v41  ;;  %v1161_v1 = vld [vmem:[%s1800_s1 + $0x54] sm:$0xf] }
  0x1b   :  { %477 = vmatpush.bf16.msra.mxu3 %v1010_v10  ;;  %v915_v53 = vld [vmem:[%s1800_s1 + $0xe8] sm:$0xf0]  ;;  %v1195_v54 = vld [vmem:[%s1800_s1 + $0x164] sm:$0xf]  ;;  %v1557_v59 = vpack.c.b16 %v101_v50, %v101_v50  ;;  %v854_v61 = vor.u32 %v1163_v47, %v851_v48  ;;  %v1561_v62 = vpack.c.b16 %v102_v51, %v102_v51  ;;  %v843_v2 = vld [vmem:[%s1800_s1 + $0x58] sm:$0xf0] }
  0x1c   :  { %439 = vmatpush.bf16.msra.mxu0 %v810_v16  ;;  %v979_v55 = vld [vmem:[%s1800_s1 + $0x168] sm:$0xf0]  ;;  %v1211_v57 = vld [vmem:[%s1800_s1 + $0x1e4] sm:$0xf]  ;;  %v918_v63 = vor.u32 %v1179_v49, %v915_v53  ;;  %v1177_v3 = vld [vmem:[%s1800_s1 + $0xd4] sm:$0xf]  ;;  %v846_v10 = vor.u32 %v1161_v1, %v843_v2 }
  0x1d   :  { %452 = vmatpush.bf16.msra.mxu1 %v874_v20  ;;  %v1043_v58 = vld [vmem:[%s1800_s1 + $0x1e8] sm:$0xf0]  ;;  %v982_v0 = vor.u32 %v1195_v54, %v979_v55  ;;  %v907_v5 = vld [vmem:[%s1800_s1 + $0xd8] sm:$0xf0]  ;;  %v1193_v6 = vld [vmem:[%s1800_s1 + $0x154] sm:$0xf] }
  0x1e   :  { %465 = vmatpush.bf16.msra.mxu2 %v938_v21  ;;  %v1046_v4 = vor.u32 %v1211_v57, %v1043_v58  ;;  %v971_v7 = vld [vmem:[%s1800_s1 + $0x158] sm:$0xf0]  ;;  %v1209_v8 = vld [vmem:[%s1800_s1 + $0x1d4] sm:$0xf]  ;;  %v910_v11 = vor.u32 %v1177_v3, %v907_v5  ;;  %v1159_v13 = vld [vmem:[%s1800_s1 + $0x44] sm:$0xf] }
  0x1f   :  { %478 = vmatpush.bf16.msra.mxu3 %v1002_v25  ;;  %v1035_v9 = vld [vmem:[%s1800_s1 + $0x1d8] sm:$0xf0]  ;;  %v974_v12 = vor.u32 %v1193_v6, %v971_v7  ;;  %v835_v14 = vld [vmem:[%s1800_s1 + $0x48] sm:$0xf0]  ;;  %v1175_v15 = vld [vmem:[%s1800_s1 + $0xc4] sm:$0xf] }
  0x20   :  { %440 = vmatpush.bf16.msra.mxu0 %v802_v32  ;;  %v1038_v16 = vor.u32 %v1209_v8, %v1035_v9  ;;  %v899_v17 = vld [vmem:[%s1800_s1 + $0xc8] sm:$0xf0]  ;;  %v1191_v18 = vld [vmem:[%s1800_s1 + $0x144] sm:$0xf]  ;;  %v838_v22 = vor.u32 %v1159_v13, %v835_v14  ;;  %v1157_v25 = vld [vmem:[%s1800_s1 + $0x34] sm:$0xf] }
  0x21   :  { %453 = vmatpush.bf16.msra.mxu1 %v866_v37  ;;  %v963_v19 = vld [vmem:[%s1800_s1 + $0x148] sm:$0xf0]  ;;  %v1207_v20 = vld [vmem:[%s1800_s1 + $0x1c4] sm:$0xf]  ;;  %v902_v23 = vor.u32 %v1175_v15, %v899_v17  ;;  %v827_v26 = vld [vmem:[%s1800_s1 + $0x38] sm:$0xf0] }
  0x22   :  { %466 = vmatpush.bf16.msra.mxu2 %v930_v38  ;;  %v1027_v21 = vld [vmem:[%s1800_s1 + $0x1c8] sm:$0xf0]  ;;  %v966_v24 = vor.u32 %v1191_v18, %v963_v19  ;;  %v1173_v27 = vld [vmem:[%s1800_s1 + $0xb4] sm:$0xf]  ;;  %v891_v29 = vld [vmem:[%s1800_s1 + $0xb8] sm:$0xf0]  ;;  %v830_v34 = vor.u32 %v1157_v25, %v827_v26 }
  0x23   :  { %479 = vmatpush.bf16.msra.mxu3 %v994_v42  ;;  %441 = vmatmul.bf16.vlgmr.msra.gmra.mxu0 %v1557_v59  ;;  %v1030_v28 = vor.u32 %v1207_v20, %v1027_v21  ;;  %v1189_v30 = vld [vmem:[%s1800_s1 + $0x134] sm:$0xf]  ;;  %v955_v31 = vld [vmem:[%s1800_s1 + $0x138] sm:$0xf0] }
  0x24   :  { %485 = vmatpush.bf16.msrb.mxu0 %v862_v43  ;;  %454 = vmatmul.bf16.vlgmr.msra.gmra.mxu1 %v1561_v62  ;;  %v1205_v32 = vld [vmem:[%s1800_s1 + $0x1b4] sm:$0xf]  ;;  %v1019_v33 = vld [vmem:[%s1800_s1 + $0x1b8] sm:$0xf0] }
  0x25   :  { %498 = vmatpush.bf16.msrb.mxu1 %v926_v45  ;;  %467 = vmatmul.bf16.vlgmr.msra.gmra.mxu2 %v1549_v56 }
  0x26   :  { %511 = vmatpush.bf16.msrb.mxu2 %v990_v46  ;;  %480 = vmatmul.bf16.vlgmr.msra.gmra.mxu3 %v1559_v60 }
  0x27   :  { %524 = vmatpush.bf16.msrb.mxu3 %v1054_v52 }
  0x28   :  { %486 = vmatpush.bf16.msrb.mxu0 %v854_v61 }
  0x29   :  { %499 = vmatpush.bf16.msrb.mxu1 %v918_v63 }
  0x2a   :  { %512 = vmatpush.bf16.msrb.mxu2 %v982_v0 }
  0x2b   :  { %525 = vmatpush.bf16.msrb.mxu3 %v1046_v4 }
  0x2c   :  { %487 = vmatpush.bf16.msrb.mxu0 %v846_v10 }
  0x2d   :  { %500 = vmatpush.bf16.msrb.mxu1 %v910_v11 }
  0x2e   :  { %513 = vmatpush.bf16.msrb.mxu2 %v974_v12 }
  0x2f   :  { %526 = vmatpush.bf16.msrb.mxu3 %v1038_v16 }
  0x30   :  { %488 = vmatpush.bf16.msrb.mxu0 %v838_v22 }
  0x31   :  { %12 = vsyncpa [#allocation3], 0  ;;  %501 = vmatpush.bf16.msrb.mxu1 %v902_v23  ;;  %v894_v35 = vor.u32 %v1173_v27, %v891_v29  ;;  %v958_v36 = vor.u32 %v1189_v30, %v955_v31  ;;  %v1155_v37 = vld [vmem:[%s1800_s1 + $0x24] sm:$0xf]  ;;  %v819_v38 = vld [vmem:[%s1800_s1 + $0x28] sm:$0xf0]  ;;  %v1022_v40 = vor.u32 %v1205_v32, %v1019_v33 }
  0x32   :  { %514 = vmatpush.bf16.msrb.mxu2 %v966_v24  ;;  %v1171_v39 = vld [vmem:[%s1800_s1 + $0xa4] sm:$0xf]  ;;  %v883_v41 = vld [vmem:[%s1800_s1 + $0xa8] sm:$0xf0]  ;;  %v822_v46 = vor.u32 %v1155_v37, %v819_v38  ;;  %v1153_v49 = vld [vmem:[%s1800_s1 + $0x14] sm:$0xf] }
  0x33   :  { %527 = vmatpush.bf16.msrb.mxu3 %v1030_v28  ;;  %v1187_v42 = vld [vmem:[%s1800_s1 + $0x124] sm:$0xf]  ;;  %v947_v43 = vld [vmem:[%s1800_s1 + $0x128] sm:$0xf0]  ;;  %v886_v47 = vor.u32 %v1171_v39, %v883_v41  ;;  %v811_v50 = vld [vmem:[%s1800_s1 + $0x18] sm:$0xf0] }
  0x34   :  { %v1203_v44 = vld [vmem:[%s1800_s1 + $0x1a4] sm:$0xf]  ;;  %v1011_v45 = vld [vmem:[%s1800_s1 + $0x1a8] sm:$0xf0]  ;;  %489 = vmatpush.bf16.msrb.mxu0 %v830_v34  ;;  %v950_v48 = vor.u32 %v1187_v42, %v947_v43  ;;  %v1169_v51 = vld [vmem:[%s1800_s1 + $0x94] sm:$0xf]  ;;  %v814_v61 = vor.u32 %v1153_v49, %v811_v50 }
  0x35   :  { %502 = vmatpush.bf16.msrb.mxu1 %v894_v35  ;;  %v1014_v52 = vor.u32 %v1203_v44, %v1011_v45  ;;  %v875_v53 = vld [vmem:[%s1800_s1 + $0x98] sm:$0xf0]  ;;  %v1185_v54 = vld [vmem:[%s1800_s1 + $0x114] sm:$0xf]  ;;  %v1151_v1 = vld [vmem:[%s1800_s1 + $0x4] sm:$0xf] }
  0x36   :  { %515 = vmatpush.bf16.msrb.mxu2 %v958_v36  ;;  %v939_v55 = vld [vmem:[%s1800_s1 + $0x118] sm:$0xf0]  ;;  %v1201_v57 = vld [vmem:[%s1800_s1 + $0x194] sm:$0xf]  ;;  %v878_v63 = vor.u32 %v1169_v51, %v875_v53  ;;  %v803_v2 = vld [vmem:[%s1800_s1 + $0x8] sm:$0xf0] }
  0x37   :  { %528 = vmatpush.bf16.msrb.mxu3 %v1022_v40  ;;  %v1003_v58 = vld [vmem:[%s1800_s1 + $0x198] sm:$0xf0]  ;;  %v942_v0 = vor.u32 %v1185_v54, %v939_v55  ;;  %v1167_v3 = vld [vmem:[%s1800_s1 + $0x84] sm:$0xf]  ;;  %v867_v5 = vld [vmem:[%s1800_s1 + $0x88] sm:$0xf0]  ;;  %v806_v10 = vor.u32 %v1151_v1, %v803_v2 }
  0x38   :  { %490 = vmatpush.bf16.msrb.mxu0 %v822_v46  ;;  %v1006_v4 = vor.u32 %v1201_v57, %v1003_v58  ;;  %v1183_v6 = vld [vmem:[%s1800_s1 + $0x104] sm:$0xf]  ;;  %v931_v7 = vld [vmem:[%s1800_s1 + $0x108] sm:$0xf0]  ;;  %v870_v11 = vor.u32 %v1167_v3, %v867_v5  ;;  %v1222_v14 = vld [vmem:[%s1802_s3 + $0x38] sm:$0xff]  ;;  %s1268_s28 = smov [#allocation2]  }
  0x39   :  { %503 = vmatpush.bf16.msrb.mxu1 %v886_v47  ;;  %v1199_v8 = vld [vmem:[%s1800_s1 + $0x184] sm:$0xf]  ;;  %v995_v9 = vld [vmem:[%s1800_s1 + $0x188] sm:$0xf0]  ;;  %v934_v12 = vor.u32 %v1183_v6, %v931_v7  ;;  %v1221_v15 = vld [vmem:[%s1802_s3 + $0x30] sm:$0xff]  ;;  %s788_s29 = sshll.u32 %s1268_s28, 4  ;;  %s789_s29 = int_to_ptr.vmem [resolvable:$true] %s788_s29 }
  0x3a   :  { %516 = vmatpush.bf16.msrb.mxu2 %v950_v48  ;;  %v998_v13 = vor.u32 %v1199_v8, %v995_v9  ;;  %v1220_v16 = vld [vmem:[%s1802_s3 + $0x28] sm:$0xff]  ;;  %v1219_v17 = vld [vmem:[%s1802_s3 + $0x20] sm:$0xff]  ;;  %v1229_v19 = vld [vmem:[%s1802_s3 + $0x70] sm:$0xff]  ;;  %s790_s30 = sshll.u32 %s1806_s7, 4  ;;  %s791_s30 = int_to_ptr.hbm [resolvable:$true] %s790_s30 }
  0x3b   :  { %529 = vmatpush.bf16.msrb.mxu3 %v1014_v52  ;;  %v1215_v18 = vld [vmem:[%s1802_s3] sm:$0xff]  ;;  %v1228_v20 = vld [vmem:[%s1802_s3 + $0x68] sm:$0xff]  ;;  %v1226_v23 = vld [vmem:[%s1802_s3 + $0x58] sm:$0xff] }
  0x3c   :  { %491 = vmatpush.bf16.msrb.mxu0 %v814_v61  ;;  %v1227_v21 = vld [vmem:[%s1802_s3 + $0x60] sm:$0xff]  ;;  %v1225_v25 = vld [vmem:[%s1802_s3 + $0x50] sm:$0xff]  ;;  %v1224_v30 = vld [vmem:[%s1802_s3 + $0x48] sm:$0xff] }
  0x3d   :  { %504 = vmatpush.bf16.msrb.mxu1 %v878_v63  ;;  %v93_v22 = vld [vmem:[%s1801_s2] sm:$0x3]  ;;  %v1238_v58 = vld [vmem:[%s1804_s5 + $0x38] sm:$0xff]  ;;  %v1237_v61 = vld [vmem:[%s1804_s5 + $0x30] sm:$0xff] }
  0x3e   :  { %517 = vmatpush.bf16.msrb.mxu2 %v942_v0  ;;  %v95_v24 = vperm.slane %v93_v22, 0  ;;  %v1223_v36 = vld [vmem:[%s1802_s3 + $0x40] sm:$0xff]  ;;  %v96_v42 = vperm.slane %v93_v22, 1  ;;  %v1236_v63 = vld [vmem:[%s1804_s5 + $0x28] sm:$0xff]  ;;  %v1234_v1 = vld [vmem:[%s1804_s5 + $0x18] sm:$0xff] }
  0x3f   :  { %530 = vmatpush.bf16.msrb.mxu3 %v1006_v4  ;;  %v1235_v0 = vld [vmem:[%s1804_s5 + $0x20] sm:$0xff]  ;;  %v1233_v2 = vld [vmem:[%s1804_s5 + $0x10] sm:$0xff]  ;;  %v1232_v3 = vld [vmem:[%s1804_s5 + $0x8] sm:$0xff] }
  0x40   :  { %492 = vmatpush.bf16.msrb.mxu0 %v806_v10  ;;  %v1231_v5 = vld [vmem:[%s1804_s5] sm:$0xff] }
  0x41   :  { %505 = vmatpush.bf16.msrb.mxu1 %v870_v11  ;;  %v1240_v7 = vld [vmem:[%s1803_s4] ss:$0 sm:$0xff] }
  0x42   :  { %518 = vmatpush.bf16.msrb.mxu2 %v934_v12 }
  0x43   :  { %531 = vmatpush.bf16.msrb.mxu3 %v998_v13  ;;  %493 = vmatmul.bf16.vlgmr.msrb.gmra.mxu0 %v1557_v59  ;;  %v1218_v59 = vld [vmem:[%s1802_s3 + $0x18] sm:$0xff] }
  0x44   :  { %673 = vmatpush.bf16.msra.mxu0 %v1222_v14  ;;  %506 = vmatmul.bf16.vlgmr.msrb.gmra.mxu1 %v1561_v62  ;;  %v1230_v62 = vld [vmem:[%s1802_s3 + $0x78] sm:$0xff]  ;;  %v1241_v14 = vld [vmem:[%s1805_s6] ss:$0 sm:$0xff] }
  0x45   :  { %519 = vmatmul.bf16.vlgmr.msrb.gmra.mxu2 %v1549_v56  ;;  %v1217_v56 = vld [vmem:[%s1802_s3 + $0x10] sm:$0xff]  ;;  %686 = vmatpush.bf16.msra.mxu1 %v1230_v62 }
  0x46   :  { %532 = vmatmul.bf16.vlgmr.msrb.gmra.mxu3 %v1559_v60  ;;  %v1216_v60 = vld [vmem:[%s1802_s3 + $0x8] sm:$0xff]  ;;  %769 = vmatpush.bf16.msra.mxu2 %v1238_v58 }
  0x48   :  { %674 = vmatpush.bf16.msra.mxu0 %v1221_v15 }
  0x49   :  { %687 = vmatpush.bf16.msra.mxu1 %v1229_v19 }
  0x4a   :  { %770 = vmatpush.bf16.msra.mxu2 %v1237_v61 }
  0x4c   :  { %675 = vmatpush.bf16.msra.mxu0 %v1220_v16 }
  0x4d   :  { %688 = vmatpush.bf16.msra.mxu1 %v1228_v20 }
  0x4e   :  { %771 = vmatpush.bf16.msra.mxu2 %v1236_v63 }
  0x50   :  { %676 = vmatpush.bf16.msra.mxu0 %v1219_v17 }
  0x51   :  { %689 = vmatpush.bf16.msra.mxu1 %v1227_v21 }
  0x52   :  { %772 = vmatpush.bf16.msra.mxu2 %v1235_v0 }
  0x54   :  { %677 = vmatpush.bf16.msra.mxu0 %v1218_v59 }
  0x55   :  { %690 = vmatpush.bf16.msra.mxu1 %v1226_v23 }
  0x56   :  { %773 = vmatpush.bf16.msra.mxu2 %v1234_v1 }
  0x58   :  { %678 = vmatpush.bf16.msra.mxu0 %v1217_v56 }
  0x59   :  { %691 = vmatpush.bf16.msra.mxu1 %v1225_v25 }
  0x5a   :  { %774 = vmatpush.bf16.msra.mxu2 %v1233_v2 }
  0x5c   :  { %679 = vmatpush.bf16.msra.mxu0 %v1216_v60 }
  0x5d   :  { %692 = vmatpush.bf16.msra.mxu1 %v1224_v30 }
  0x5e   :  { %775 = vmatpush.bf16.msra.mxu2 %v1232_v3 }
  0x60   :  { %680 = vmatpush.bf16.msra.mxu0 %v1215_v18 }
  0x61   :  { %693 = vmatpush.bf16.msra.mxu1 %v1223_v36 }
  0x62   :  { %776 = vmatpush.bf16.msra.mxu2 %v1231_v5 }
  0xa0   :  { %v442_v26 = vpop.f32.mrf.mxu0 }
  0xa1   :  { %v443_v27 = vadd.f32 %v442_v26, %v95_v24  ;;  %v455_v28 = vpop.f32.mrf.mxu1 }
  0xa3   :  { %v456_v29 = vadd.f32 %v455_v28, %v443_v27 }
  0xa8   :  { %v468_v31 = vpop.f32.mrf.mxu2  ;;  %v444_v35 = vpop.f32.mrf.mxu0 }
  0xa9   :  { %v469_v32 = vadd.f32 %v468_v31, %v456_v29  ;;  %v481_v33 = vpop.f32.mrf.mxu3  ;;  %v457_v37 = vpop.f32.mrf.mxu1 }
  0xab   :  { %v482_v34 = vadd.f32 %v481_v33, %v469_v32 }
  0xad   :  { %v537_v38 = vmax.f32 %v482_v34, 0.0 }
  0xaf   :  { %v539_v39 = vpack.c.bf16 %v537_v38, %v537_v38 }
  0xb0   :  { %v470_v40 = vpop.f32.mrf.mxu2 }
  0xb1   :  { %681 = vmatmul.bf16.vlgmr.msra.gmra.mxu0 %v539_v39  ;;  %v483_v41 = vpop.f32.mrf.mxu3 }
  0xc0   :  { %v494_v43 = vpop.f32.mrf.mxu0 }
  0xc1   :  { %v495_v44 = vadd.f32 %v494_v43, %v96_v42  ;;  %v507_v45 = vpop.f32.mrf.mxu1 }
  0xc3   :  { %v508_v46 = vadd.f32 %v507_v45, %v495_v44 }
  0xc8   :  { %v520_v47 = vpop.f32.mrf.mxu2  ;;  %v496_v50 = vpop.f32.mrf.mxu0 }
  0xc9   :  { %v521_v48 = vadd.f32 %v520_v47, %v508_v46  ;;  %v533_v49 = vpop.f32.mrf.mxu3  ;;  %v509_v51 = vpop.f32.mrf.mxu1 }
  0xcb   :  { %v534_v52 = vadd.f32 %v533_v49, %v521_v48 }
  0xcd   :  { %v538_v53 = vmax.f32 %v534_v52, 0.0 }
  0xcf   :  { %v540_v54 = vpack.c.bf16 %v538_v53, %v538_v53 }
  0xd0   :  { %v522_v55 = vpop.f32.mrf.mxu2 }
  0xd1   :  { %v535_v57 = vpop.f32.mrf.mxu3  ;;  %694 = vmatmul.bf16.vlgmr.msra.gmra.mxu1 %v540_v54 }
 0x12e   :  { %v682_v4 = vpop.f32.mrf.mxu0 }
 0x12f   :  { %v683_v8 = vadd.f32 %v1240_v7, %v682_v4 }
 0x136   :  { %v684_v6 = vpop.f32.mrf.mxu0 }
 0x14e   :  { %v695_v9 = vpop.f32.mrf.mxu1 }
 0x14f   :  { %v696_v10 = vadd.f32 %v695_v9, %v683_v8 }
 0x151   :  { %v699_v11 = vmax.f32 %v696_v10, 0.0 }
 0x153   :  { %v700_v12 = vpack.c.bf16 %v699_v11, %v699_v11 }
 0x155   :  { %777 = vmatmul.bf16.vlgmr.msra.gmra.mxu2 %v700_v12 }
 0x156   :  { %v697_v13 = vpop.f32.mrf.mxu1 }
 0x1d8   :  { %v778_v15 = vpop.f32.mrf.mxu2 }
 0x1d9   :  { %v779_v16 = vadd.f32 %v1241_v14, %v778_v15 }
 0x1db   :  { %782 = vst [vmem:[#allocation2] sm:$0xff] %v779_v16 }
 0x1dc   :  { %793 = dma.vmem_to_hbm [thread:$0]  %s789_s29, 128, %s791_s30, [#allocation3]  }
 0x1e0   :  { %v780_v17 = vpop.f32.mrf.mxu2 }
 0x1e1   :  { %1266 = dma.done.wait [#allocation3], 128  }
 0x1e2   :  { %1267 = vsyncadd [#allocation3], 4294967168 }
 0x1e3   :  { %798 = vsyncpa [#allocation3], 1 }

</bundles_post_ra>
